<compile_context>
chip_gen: v6e
topology: v6e:2x2x1
jax: 0.10.0
libtpu: 0.0.40
codegen_flags: <defaults>
</compile_context>

<pallas_src>
import functools
from typing import NamedTuple

import jax
import jax.numpy as jnp
from jax.experimental import pallas as pl
from jax.experimental.pallas import tpu as pltpu


_EPS = 1e-12       # F.normalize default eps (clamps the *norm*)
_NEG_BIG = -1e30   # finite "-inf" baked into padded softmax bias lanes


def _round_up(x, m):
    return pl.cdiv(x, m) * m


class PFFLayerParams(NamedTuple):
    """Padded per-layer parameters, built ONCE at init (not per forward)."""
    w_p: jax.Array        # (size_below, n_pad), zero-padded columns
    b_relu_p: jax.Array   # (1, n_pad), 0 in padded lanes -> relu(0) = 0
    b_soft_p: jax.Array   # (1, n_pad), -1e30 in padded lanes -> softmax -> 0
    valid_n: int          # true output feature count (size)


def prepare_pff_params(w, b, *, mxu_dtype=jnp.float32):
    """Pad W / bias to a lane-dense (multiple-of-128) feature axis, once."""
    K, N = w.shape
    n_pad = int(_round_up(N, 128))
    w_p = jnp.zeros((K, n_pad), mxu_dtype).at[:, :N].set(w.astype(mxu_dtype))
    b32 = b.astype(jnp.float32)
    b_relu = jnp.zeros((1, n_pad), jnp.float32).at[:, :N].set(b32)
    b_soft = jnp.full((1, n_pad), _NEG_BIG, jnp.float32).at[:, :N].set(b32)
    return PFFLayerParams(w_p, b_relu, b_soft, int(N))


def _pff_forward_kernel(x_ref, w_ref, b_ref, o_ref, *, is_top):
    # One batch tile per grid step: normalize -> matmul -> bias -> relu/softmax.
    x = x_ref[...].astype(jnp.float32)

    # F.normalize(x, dim=1) == x / max(||x||, eps) == x * rsqrt(max(||x||^2, eps^2))
    sq = jnp.sum(x * x, axis=1, keepdims=True)
    xn = x * jax.lax.rsqrt(jnp.maximum(sq, _EPS * _EPS))

    # MXU matmul; operands in W's dtype (f32 or bf16), f32 accumulation.
    y = jnp.dot(xn.astype(w_ref.dtype), w_ref[...],
                preferred_element_type=jnp.float32)
    y = y + b_ref[...]                                  # (1, n_pad) f32 broadcast

    if is_top:
        # Padded lanes carry bias = -1e30, so exp underflows to exactly 0:
        # no iota/where masking needed.
        m = jnp.max(y, axis=1, keepdims=True)
        e = jnp.exp(y - m)
        inv = pl.reciprocal(jnp.sum(e, axis=1, keepdims=True), approx=True)
        o_ref[...] = (e * inv).astype(o_ref.dtype)
    else:
        o_ref[...] = jnp.maximum(y, 0.0).astype(o_ref.dtype)


def _default_block_rows(B):
    # >= 2 grid steps once B >= 16 so v7x's second TensorCore engages under
    # dimension_semantics=("parallel",); 1024-row cap keeps per-step buffers
    # tiny (< 3 MiB double-buffered) and amortizes step overhead on v5e/v6e.
    return int(max(8, min(1024, _round_up(pl.cdiv(B, 2), 8))))


@functools.partial(
    jax.jit, static_argnames=("valid_n", "is_top", "block_rows", "out_dtype"))
def pff_layer_forward(x, w_p, b_p, *, valid_n, is_top=False, block_rows=None,
                      out_dtype=jnp.float32):
    """PFFLayer.forward on pre-padded params.

    x:   (B, size_below) f32
    w_p: (size_below, n_pad) padded weights (transposed vs. torch Linear.weight)
    b_p: (1, n_pad) padded bias (relu- or softmax-flavored padding)
    """
    B, K = x.shape
    Kw, n_pad = w_p.shape
    assert Kw == K and n_pad % 128 == 0

    tb = int(block_rows) if block_rows is not None else _default_block_rows(B)

    kernel = functools.partial(_pff_forward_kernel, is_top=is_top)
    out = pl.pallas_call(
        kernel,
        out_shape=jax.ShapeDtypeStruct((B, n_pad), out_dtype),
        grid=(pl.cdiv(B, tb),),                          # ragged last block OK
        in_specs=[
            pl.BlockSpec((tb, K), lambda i: (i, 0)),     # streamed x tile
            pl.BlockSpec((K, n_pad), lambda i: (0, 0)),  # VMEM-resident W
            pl.BlockSpec((1, n_pad), lambda i: (0, 0)),  # VMEM-resident bias
        ],
        out_specs=pl.BlockSpec((tb, n_pad), lambda i: (i, 0)),
        compiler_params=pltpu.CompilerParams(
            dimension_semantics=("parallel",)),          # dual-TC shard on v7x
    )(x, w_p, b_p)

    # Column de-pad only (rows already exact). Disappears if `size` % 128 == 0.
    return out[:, :valid_n]


def pff_forward(x, params: PFFLayerParams, *, is_top=False, **kw):
    b_p = params.b_soft_p if is_top else params.b_relu_p
    return pff_layer_forward(x, params.w_p, b_p, valid_n=params.valid_n,
                             is_top=is_top, **kw)


def _reference(x, w, b, *, is_top=False):
    norm = jnp.sqrt(jnp.sum(x * x, axis=1, keepdims=True))
    xn = x / jnp.maximum(norm, _EPS)
    y = xn @ w + b[None, :]
    if is_top:
        return jax.nn.softmax(y, axis=1)
    return jnp.maximum(y, 0.0)


if __name__ == "__main__":
    # Module config (forward only touches W / bias_r):
    #   size_below = 32, size = 40 (divisible by 10 per _init_M), batch = 8
    batch, size_below, size = 8, 32, 40

    key = jax.random.PRNGKey(0)
    kx, kw, kb = jax.random.split(key, 3)
    x = jax.random.normal(kx, (batch, size_below), dtype=jnp.float32)
    w = jax.random.normal(kw, (size_below, size), dtype=jnp.float32) * 0.1
    b = jax.random.normal(kb, (size,), dtype=jnp.float32) * 0.01

    # Pad parameters ONCE (f32 MXU path).
    params = prepare_pff_params(w, b)

    # Small batch, both branches.
    out_relu = jax.block_until_ready(pff_forward(x, params, is_top=False))
    out_soft = jax.block_until_ready(pff_forward(x, params, is_top=True))
    ref_relu = _reference(x, w, b, is_top=False)
    ref_soft = _reference(x, w, b, is_top=True)
    assert out_relu.shape == (batch, size)
    assert out_soft.shape == (batch, size)
    assert jnp.allclose(out_relu, ref_relu, atol=2e-5, rtol=2e-5)
    assert jnp.allclose(out_soft, ref_soft, atol=2e-3, rtol=2e-3)  # approx recip

    # Larger batch: default tiling gives 2 "parallel" steps (504 + ragged 496),
    # no x padding / copy; explicit block_rows=128 exercises a very ragged
    # last block (1000 = 7*128 + 104).
    big_b = 1000
    xb = jax.random.normal(jax.random.PRNGKey(1), (big_b, size_below),
                           dtype=jnp.float32)
    ref_big_relu = _reference(xb, w, b, is_top=False)
    ref_big_soft = _reference(xb, w, b, is_top=True)

    out_big_relu = jax.block_until_ready(pff_forward(xb, params, is_top=False))
    out_big_soft = jax.block_until_ready(pff_forward(xb, params, is_top=True))
    assert out_big_relu.shape == (big_b, size)
    assert jnp.allclose(out_big_relu, ref_big_relu, atol=2e-5, rtol=2e-5)
    assert jnp.allclose(out_big_soft, ref_big_soft, atol=2e-3, rtol=2e-3)

    out_rag_relu = jax.block_until_ready(
        pff_forward(xb, params, is_top=False, block_rows=128))
    out_rag_soft = jax.block_until_ready(
        pff_forward(xb, params, is_top=True, block_rows=128))
    assert jnp.allclose(out_rag_relu, ref_big_relu, atol=2e-5, rtol=2e-5)
    assert jnp.allclose(out_rag_soft, ref_big_soft, atol=2e-3, rtol=2e-3)

    # Optional bf16 MXU-operand weights + bf16 output (v6e/v7x; keep f32 on
    # v5e): cuts output HBM bytes in half, looser tolerance.
    params_bf16 = prepare_pff_params(w, b, mxu_dtype=jnp.bfloat16)
    out_bf16 = jax.block_until_ready(
        pff_forward(xb, params_bf16, is_top=True, out_dtype=jnp.bfloat16))
    assert out_bf16.shape == (big_b, size)
    assert jnp.allclose(out_bf16.astype(jnp.float32), ref_big_soft,
                        atol=2e-2, rtol=2e-2)

    print("KERNEL_OK")
</pallas_src>

<mosaic_0001>
module attributes {stable_mosaic.version = 11 : i64} {
  func.func @_pff_forward_kernel(%arg0: i32, %arg1: memref<8x32xf32, #tpu.memory_space<vmem>>, %arg2: memref<32x128xf32, #tpu.memory_space<vmem>>, %arg3: memref<1x128xf32, #tpu.memory_space<vmem>>, %arg4: memref<8x128xf32, #tpu.memory_space<vmem>>) attributes {dimension_semantics = [#tpu.dimension_semantics<parallel>], iteration_bounds = array<i64: 1>, scalar_prefetch = 0 : i64, scratch_operands = 0 : i64, tpu.core_type = #tpu.core_type<tc>, window_params = [{transform_indices = @transform_0, window_bounds = array<i64: 8, 32>}, {pipeline_mode = #tpu.pipeline_mode<synchronous>, transform_indices = @transform_1, window_bounds = array<i64: 32, 128>}, {pipeline_mode = #tpu.pipeline_mode<synchronous>, transform_indices = @transform_2, window_bounds = array<i64: 1, 128>}, {transform_indices = @transform_3, window_bounds = array<i64: 8, 128>}]} {
    %c0 = arith.constant 0 : index
    %c0_0 = arith.constant 0 : index
    %0 = vector.load %arg1[%c0, %c0_0] : memref<8x32xf32, #tpu.memory_space<vmem>>, vector<8x32xf32>
    %1 = arith.mulf %0, %0 : vector<8x32xf32>
    %cst = arith.constant dense<0.000000e+00> : vector<8xf32>
    %2 = vector.multi_reduction <add>, %1, %cst [1] : vector<8x32xf32> to vector<8xf32>
    %3 = vector.shape_cast %2 : vector<8xf32> to vector<8x1xf32>
    %cst_1 = arith.constant 1.000000e-24 : f32
    %4 = vector.broadcast %cst_1 : f32 to vector<8x1xf32>
    %5 = arith.maximumf %3, %4 : vector<8x1xf32>
    %6 = math.rsqrt %5 : vector<8x1xf32>
    %7 = vector.broadcast %6 : vector<8x1xf32> to vector<8x32xf32>
    %8 = arith.mulf %0, %7 : vector<8x32xf32>
    %c0_2 = arith.constant 0 : index
    %c0_3 = arith.constant 0 : index
    %9 = vector.load %arg2[%c0_2, %c0_3] : memref<32x128xf32, #tpu.memory_space<vmem>>, vector<32x128xf32>
    %cst_4 = arith.constant dense<0.000000e+00> : vector<8x128xf32>
    %10 = tpu.matmul %8, %9, %cst_4 {dimension_numbers = #tpu.dot_dimension_numbers<[1], [0], [0], [1], [0, 0, 1, 1], [], []>} : vector<8x32xf32>, vector<32x128xf32>, vector<8x128xf32> -> vector<8x128xf32>
    %c0_5 = arith.constant 0 : index
    %c0_6 = arith.constant 0 : index
    %11 = vector.load %arg3[%c0_5, %c0_6] : memref<1x128xf32, #tpu.memory_space<vmem>>, vector<1x128xf32>
    %12 = vector.broadcast %11 : vector<1x128xf32> to vector<8x128xf32>
    %13 = arith.addf %10, %12 : vector<8x128xf32>
    %cst_7 = arith.constant 0.000000e+00 : f32
    %14 = vector.broadcast %cst_7 : f32 to vector<8x128xf32>
    %15 = arith.maximumf %13, %14 : vector<8x128xf32>
    %c0_8 = arith.constant 0 : index
    %c0_9 = arith.constant 0 : index
    %16 = vector.load %arg4[%c0_8, %c0_9] : memref<8x128xf32, #tpu.memory_space<vmem>>, vector<8x128xf32>
    tpu.vector_store %arg4[%c0_8, %c0_9], %15 {strides = array<i32>} : memref<8x128xf32, #tpu.memory_space<vmem>>, vector<8x128xf32>,
    return
  }
  func.func @transform_0(%arg0: i32) -> (i32, i32) {
    %c0_i32 = arith.constant 0 : i32
    %c0_i32_0 = arith.constant 0 : i32
    return %arg0, %c0_i32 : i32, i32
  }
  func.func @transform_1(%arg0: i32) -> (i32, i32) {
    %c0_i32 = arith.constant 0 : i32
    %c0_i32_0 = arith.constant 0 : i32
    %c0_i32_1 = arith.constant 0 : i32
    return %c0_i32, %c0_i32_0 : i32, i32
  }
  func.func @transform_2(%arg0: i32) -> (i32, i32) {
    %c0_i32 = arith.constant 0 : i32
    %c0_i32_0 = arith.constant 0 : i32
    %c0_i32_1 = arith.constant 0 : i32
    return %c0_i32, %c0_i32_0 : i32, i32
  }
  func.func @transform_3(%arg0: i32) -> (i32, i32) {
    %c0_i32 = arith.constant 0 : i32
    %c0_i32_0 = arith.constant 0 : i32
    return %arg0, %c0_i32 : i32, i32
  }
}

</mosaic_0001>

<bundles_post_ra>
// kernel: pff_layer_forward.1
= control target key start
LH: loop header
LB: loop body
LE: loop exit
PB: predicated region body
PF: predicated region fallthrough
CT: control target
= control target key end

     0   :  { %8 = vsyncpa [#allocation3], 0  ;;  %s286_s0 = inlined_call_operand.hbm [shape: f32[8,32], index: 0, kind: input, shape index: {}]   ;;  %s287_s1 = inlined_call_operand.hbm [shape: f32[32,128], index: 1, kind: input, shape index: {}]   ;;  %s288_s2 = inlined_call_operand.vmem [shape: f32[1,128], index: 2, kind: input, shape index: {}]   ;;  %s289_s3 = inlined_call_operand.hbm [shape: f32[8,128], index: 3, kind: output, shape index: {}]  }
   0x1   :  { %9 = vsyncpa [#allocation6], 0 }
   0x2   :  { %10 = vsyncpa [#allocation4], 0  ;;  %s245_s12 = smov [#allocation2]   ;;  %s246_s14 = smov [#allocation5]  }
   0x3   :  { %s17_s13 = sshll.u32 %s245_s12, 4  ;;  %s26_s15 = sshll.u32 %s246_s14, 4  ;;  %s18_s13 = int_to_ptr.vmem [resolvable:$true] %s17_s13  ;;  %s27_s15 = int_to_ptr.vmem [resolvable:$true] %s26_s15 }
   0x4   :  { %s187_s16 = scalar_lea.vmem %s18_s13, 128  ;;  %p192_p1 = scmp.lt.s32.totalorder %s18_s13, %s18_s13 }
   0x5   :  { %p188_p0 = scmp.ne.s32.totalorder %s18_s13, %s187_s16  ;;  %p193_p2 = scmp.lt.s32.totalorder %s187_s16, %s187_s16 }
   0x7   :  { %p194_p3 = por %p193_p2, %p192_p1 }
   0x9   :  { %p195_p4 = pnand %p194_p3, %p188_p0 }
   0xb   :  { %198 = shalt.err (!%p195_p4)
}
   0xc   :  { %20 = dma.hbm_to_vmem [thread:$0]  %s286_s0, 128, %s18_s13, [#allocation3]  }
   0xd   :  { %s207_s19 = scalar_lea.vmem %s27_s15, 512  ;;  %p212_p6 = scmp.lt.s32.totalorder %s27_s15, %s27_s15 }
   0xe   :  { %p208_p5 = scmp.ne.s32.totalorder %s27_s15, %s207_s19  ;;  %p213_p7 = scmp.lt.s32.totalorder %s207_s19, %s207_s19 }
  0x10   :  { %p214_p8 = por %p213_p7, %p212_p6 }
  0x12   :  { %p215_p9 = pnand %p214_p8, %p208_p5 }
  0x14   :  { %218 = shalt.err (!%p215_p9)
}
  0x15   :  { %s247_s20 = smov 128   ;;  %s248_s21 = smov 8  }
  0x16   :  { %32 = dma.hbm_to_vmem [thread:$0]  %s287_s1, 512, %s27_s15, [#allocation6], %s247_s20, %s247_s20, %s248_s21  }
  0x17   :  { %239 = dma.done.wait [#allocation3], 128  }
  0x18   :  { %240 = vsyncadd [#allocation3], 4294967168 }
  0x19   :  { %241 = dma.done.wait [#allocation6], 512  }
  0x1a   :  { %242 = vsyncadd [#allocation6], 4294966784  ;;  %v41_v0 = vld [vmem:[#allocation2] sm:$0xff]  ;;  %vm43_vm0 = vcmask 261120   ;;  %v249_v4 = vmov 0.0   ;;  %v52_v5 = vld [vmem:[#allocation5 + $0x10] sm:$0xff] }
  0x1b   :  { %v42_v1 = vmul.f32 %v41_v0, %v41_v0  ;;  %v53_v3 = vld [vmem:[#allocation5 + $0x18] sm:$0xff]  ;;  %159 = vmatprep.subr.mxu0 %v249_v4  ;;  %vm250_vm1 = vmmov 0   ;;  %v51_v6 = vld [vmem:[#allocation5 + $0x8] sm:$0xff]  ;;  %v50_v7 = vld [vmem:[#allocation5] sm:$0xff]  ;;  %s251_s24 = smov [#allocation7]  }
  0x1c   :  { %167 = vmatprep.mubr.msk.f32.mxu0 %vm250_vm1, %v249_v4  ;;  %160 = vmatpush3.msra.mxu0 %v53_v3  ;;  %v152_v12 = vld [vmem:[%s288_s2] ss:$0 sm:$0xff]  ;;  %s142_s25 = sshll.u32 %s251_s24, 4  ;;  %s143_s25 = int_to_ptr.vmem [resolvable:$true] %s142_s25 }
  0x1d   :  { %v44_v2 = vsel %vm43_vm0, %v42_v1, 0.0  ;;  %161 = vmatprep.subr.mxu0 %v249_v4  ;;  %s219_s26 = scalar_lea.vmem %s143_s25, 128  ;;  %p224_p11 = scmp.lt.s32.totalorder %s143_s25, %s143_s25 }
  0x1e   :  { %45 = vadd.xlane.f32.xlu0 %v44_v2  ;;  %162 = vmatpush3.msra.mxu0 %v52_v5  ;;  %p220_p10 = scmp.ne.s32.totalorder %s143_s25, %s219_s26  ;;  %p225_p12 = scmp.lt.s32.totalorder %s219_s26, %s219_s26 }
  0x1f   :  { %163 = vmatprep.subr.mxu0 %v249_v4 }
  0x20   :  { %164 = vmatpush3.msra.mxu0 %v51_v6  ;;  %p226_p13 = por %p225_p12, %p224_p11 }
  0x21   :  { %165 = vmatprep.subr.mxu0 %v249_v4 }
  0x22   :  { %166 = vmatpush3.msra.mxu0 %v50_v7  ;;  %p227_p0 = pnand %p226_p13, %p220_p10 }
  0xa7   :  { %v46_v8 = vpop.xlane.xlu0 %45 }
  0xa8   :  { %v47_v9 = vmax.f32 %v46_v8, 1e-24 }
  0xaa   :  { %177 = vrsqrt.f32 %v47_v9 }
  0xb7   :  { %v178_v10 = vpop.eup %177 }
  0xb8   :  { %v49_v11 = vmul.f32 %v178_v10, %v41_v0 }
  0xba   :  { %168 = vmatmul.mubr.msk.f32.vlgmr.msra.gmra.mxu0 %vm43_vm0, %v49_v11 }
 0x17a   :  { %v130_v13 = vpop.f32.mrf.mxu0 }
 0x17b   :  { %v131_v14 = vadd.f32 %v152_v12, %v130_v13 }
 0x17c   :  { %v169_v15 = vpop.f32.mrf.mxu0 }
 0x17d   :  { %v134_v16 = vmax.f32 %v131_v14, 0.0 }
 0x17f   :  { %135 = vst [vmem:[#allocation7] sm:$0xff] %v134_v16 }
 0x180   :  { %230 = shalt.err (!%p227_p0)
}
 0x181   :  { %145 = dma.vmem_to_hbm [thread:$0]  %s143_s25, 128, %s289_s3, [#allocation4]  }
 0x182   :  { %243 = dma.done.wait [#allocation4], 128  }
 0x183   :  { %244 = vsyncadd [#allocation4], 4294967168 }
 0x184   :  { %149 = vsyncpa [#allocation3], 1 }
 0x185   :  { %150 = vsyncpa [#allocation6], 1 }
 0x186   :  { %151 = vsyncpa [#allocation4], 1 }

</bundles_post_ra>
